<compile_context>
chip_gen: v6e
topology: v6e:2x2x1
jax: 0.10.0
libtpu: 0.0.40
codegen_flags: <defaults>
</compile_context>

<pallas_src>
import functools

import jax
import jax.numpy as jnp
import numpy as np
from jax.experimental import pallas as pl
from jax.experimental.pallas import tpu as pltpu


# ----------------------------------------------------------------------------
# Generation-aware VMEM configuration
# ----------------------------------------------------------------------------
def _round_up(x, m):
    return ((x + m - 1) // m) * m


def _vmem_config():
    """Return (scoped vmem_limit_bytes, per-kernel tile budget bytes)."""
    cap = None
    try:
        cap = getattr(pltpu.get_tpu_info(), "vmem_capacity_bytes", None)
    except Exception:  # pragma: no cover - query can fail off-TPU / old runtimes
        cap = None
    if cap is None:
        cap = 64 * 1024 * 1024  # be conservative (v7x-sized)
    if cap >= 100 * 1024 * 1024:        # 128 MiB parts: v5e / v6e
        limit = 96 * 1024 * 1024
    else:                               # 64 MiB parts: v7x
        limit = 40 * 1024 * 1024
    budget = int(limit * 0.75)          # headroom for compiler scratch / spills
    return limit, budget


def _pick_batch_tile(batch, per_tb_bytes, const_bytes, budget_bytes):
    """Largest batch tile (multiple of 8, or full batch) fitting the budget.

    Also caps the tile so the grid has >= 2 steps when batch >= 16, keeping
    both TensorCores busy on v7x under dimension_semantics=("parallel",).
    """
    if batch <= 8:
        return batch
    per_tb_bytes = max(int(per_tb_bytes), 1)
    avail = max(int(budget_bytes) - int(const_bytes), 8 * per_tb_bytes)
    tb = max(8, (avail // per_tb_bytes) // 8 * 8)
    if batch >= 16:
        tb = min(tb, _round_up(pl.cdiv(batch, 2), 8))
    return min(tb, batch)


# ----------------------------------------------------------------------------
# Fused kernel: masked mean pooling -> head (Linear/ReLU/Linear) -> Student-t
# cluster soft assignment.  The pooled (TB, H) embedding never leaves VMEM.
# ----------------------------------------------------------------------------
def scclbert_fused_kernel(h_ref, m_ref, w1_ref, b1_ref, w2_ref, b2_ref,
                          c_ref, csq_ref, emb_ref, head_ref, prob_ref,
                          *, inv_alpha, power, k_valid):
    # ---- masked mean pooling: sum(h * mask, S) / sum(mask, S)
    # Multiply in bf16 (no full-tile f32 copy), accumulate the S-reduction in
    # f32.  Mask values are 0/1 so the bf16 product is exact.
    h = h_ref[...]                                        # (TB, S, H) bf16
    m = m_ref[...]                                        # (TB, S)   f32
    hm = h * m.astype(h.dtype)[..., None]                 # (TB, S, H) bf16
    num = jnp.sum(hm, axis=1, dtype=jnp.float32)          # (TB, H)   f32 acc
    # Clamp keeps all-padding rows finite (PyTorch reference would produce
    # NaN/Inf there) -- intentional, documented divergence.
    den = jnp.maximum(jnp.sum(m, axis=1, keepdims=True), 1e-9)   # (TB, 1)
    emb = num / den
    emb_ref[...] = emb

    e_bf = emb.astype(jnp.bfloat16)

    # ---- head: Linear -> ReLU -> Linear (bf16 MXU operands, f32 accumulate)
    h1 = jnp.dot(e_bf, w1_ref[...], preferred_element_type=jnp.float32) + b1_ref[...]
    h1 = jnp.maximum(h1, 0.0)
    h2 = jnp.dot(h1.astype(jnp.bfloat16), w2_ref[...],
                 preferred_element_type=jnp.float32) + b2_ref[...]
    head_ref[...] = h2

    # ---- Student-t cluster assignment on the SAME resident embedding tile.
    # ||e - c||^2 = ||e||^2 + ||c||^2 - 2 e.c^T ; ||c||^2 precomputed in wrapper.
    e_sq = jnp.sum(emb * emb, axis=1, keepdims=True)      # (TB, 1)  f32
    cross = jax.lax.dot_general(                          # (TB, Kp) via MXU
        e_bf, c_ref[...],
        dimension_numbers=(((1,), (1,)), ((), ())),
        preferred_element_type=jnp.float32)
    ns = jnp.maximum(e_sq + csq_ref[...] - 2.0 * cross, 0.0)
    numr = 1.0 / (1.0 + ns * inv_alpha)
    if power != 1.0:
        numr = jnp.exp(power * jnp.log(numr))             # numr > 0 always
    # Mask out lane-padding clusters before normalizing.
    valid = jax.lax.broadcasted_iota(jnp.int32, numr.shape, 1) < k_valid
    numr = jnp.where(valid, numr, 0.0)
    denom = jnp.sum(numr, axis=1, keepdims=True)
    prob_ref[...] = numr / denom                          # exact normalization


def scclbert_fused(hidden_states, attention_mask, w1_bf16, b1, w2_bf16, b2,
                   centers_bf16, centers_sq, *, k_valid, alpha=1.0,
                   batch_tile=None):
    """Fused pooling + head + cluster-prob.

    hidden_states: (B, S, H) bf16 (preferred) or f32; attention_mask: (B, S) f32.
    Returns (embeddings f32 (B, H), head_out f32 (B, H), probs f32 (B, k_valid)).
    """
    assert alpha > 0.0
    B, S, H = hidden_states.shape
    Kp = centers_bf16.shape[0]
    h_bytes = jnp.dtype(hidden_states.dtype).itemsize
    vmem_limit, vmem_budget = _vmem_config()
    if batch_tile is None:
        per_tb = (2 * S * H * h_bytes          # hidden tile, double-buffered
                  + 2 * S * 4                  # mask, double-buffered
                  + 2 * 2 * H * 4              # emb + head outputs, dbl-buffered
                  + 2 * Kp * 4                 # probs output, double-buffered
                  + S * H * h_bytes            # masked-product temp
                  + 4 * H * 4                  # num / emb / h1 / h2 f32 temps
                  + 2 * Kp * 4)                # cross / ns temps
        const = 2 * (2 * H * H * 2 + 2 * H * 4 + Kp * H * 2 + Kp * 4)
        batch_tile = _pick_batch_tile(B, per_tb, const, vmem_budget)
    grid = (pl.cdiv(B, batch_tile),)
    kernel = functools.partial(
        scclbert_fused_kernel,
        inv_alpha=1.0 / float(alpha),
        power=float(alpha + 1) / 2.0,
        k_valid=int(k_valid))
    emb, head_out, probs = pl.pallas_call(
        kernel,
        out_shape=(
            jax.ShapeDtypeStruct((B, H), jnp.float32),
            jax.ShapeDtypeStruct((B, H), jnp.float32),
            jax.ShapeDtypeStruct((B, Kp), jnp.float32),
        ),
        grid=grid,
        in_specs=[
            pl.BlockSpec((batch_tile, S, H), lambda i: (i, 0, 0)),   # tokens (stream)
            pl.BlockSpec((batch_tile, S), lambda i: (i, 0)),         # mask (stream)
            pl.BlockSpec((H, H), lambda i: (0, 0)),                  # w1 (resident)
            pl.BlockSpec((1, H), lambda i: (0, 0)),                  # b1
            pl.BlockSpec((H, H), lambda i: (0, 0)),                  # w2 (resident)
            pl.BlockSpec((1, H), lambda i: (0, 0)),                  # b2
            pl.BlockSpec((Kp, H), lambda i: (0, 0)),                 # centers bf16
            pl.BlockSpec((1, Kp), lambda i: (0, 0)),                 # ||c||^2 f32
        ],
        out_specs=(
            pl.BlockSpec((batch_tile, H), lambda i: (i, 0)),
            pl.BlockSpec((batch_tile, H), lambda i: (i, 0)),
            pl.BlockSpec((batch_tile, Kp), lambda i: (i, 0)),
        ),
        compiler_params=pltpu.CompilerParams(
            dimension_semantics=("parallel",),
            vmem_limit_bytes=vmem_limit,
        ),
    )(hidden_states, attention_mask, w1_bf16, b1, w2_bf16, b2,
      centers_bf16, centers_sq)
    return emb, head_out, probs[:, :k_valid]


# ----------------------------------------------------------------------------
# Standalone masked mean pooling (get_embeddings on its own)
# ----------------------------------------------------------------------------
def masked_mean_kernel(h_ref, m_ref, o_ref):
    h = h_ref[...]                                        # (TB, S, H) bf16
    m = m_ref[...]                                        # (TB, S)   f32
    hm = h * m.astype(h.dtype)[..., None]
    num = jnp.sum(hm, axis=1, dtype=jnp.float32)
    den = jnp.maximum(jnp.sum(m, axis=1, keepdims=True), 1e-9)
    o_ref[...] = num / den


def masked_mean_pool(hidden_states, attention_mask, *, batch_tile=None):
    B, S, H = hidden_states.shape
    h_bytes = jnp.dtype(hidden_states.dtype).itemsize
    vmem_limit, vmem_budget = _vmem_config()
    if batch_tile is None:
        per_tb = (2 * S * H * h_bytes + 2 * S * 4 + 2 * H * 4
                  + S * H * h_bytes + 2 * H * 4)
        batch_tile = _pick_batch_tile(B, per_tb, 0, vmem_budget)
    grid = (pl.cdiv(B, batch_tile),)
    return pl.pallas_call(
        masked_mean_kernel,
        out_shape=jax.ShapeDtypeStruct((B, H), jnp.float32),
        grid=grid,
        in_specs=[
            pl.BlockSpec((batch_tile, S, H), lambda i: (i, 0, 0)),
            pl.BlockSpec((batch_tile, S), lambda i: (i, 0)),
        ],
        out_specs=pl.BlockSpec((batch_tile, H), lambda i: (i, 0)),
        compiler_params=pltpu.CompilerParams(
            dimension_semantics=("parallel",),
            vmem_limit_bytes=vmem_limit,
        ),
    )(hidden_states, attention_mask)


# ----------------------------------------------------------------------------
# Standalone head + cluster prob (for pre-computed embeddings, e.g. the
# augmented views in local_consistency).
# ----------------------------------------------------------------------------
def head_cluster_kernel(e_ref, w1_ref, b1_ref, w2_ref, b2_ref, c_ref, csq_ref,
                        head_ref, prob_ref, *, inv_alpha, power, k_valid):
    e = e_ref[...]                                        # (TB, H) f32
    e_bf = e.astype(jnp.bfloat16)

    h1 = jnp.dot(e_bf, w1_ref[...], preferred_element_type=jnp.float32) + b1_ref[...]
    h1 = jnp.maximum(h1, 0.0)
    h2 = jnp.dot(h1.astype(jnp.bfloat16), w2_ref[...],
                 preferred_element_type=jnp.float32) + b2_ref[...]
    head_ref[...] = h2

    e_sq = jnp.sum(e * e, axis=1, keepdims=True)
    cross = jax.lax.dot_general(
        e_bf, c_ref[...],
        dimension_numbers=(((1,), (1,)), ((), ())),
        preferred_element_type=jnp.float32)
    ns = jnp.maximum(e_sq + csq_ref[...] - 2.0 * cross, 0.0)
    numr = 1.0 / (1.0 + ns * inv_alpha)
    if power != 1.0:
        numr = jnp.exp(power * jnp.log(numr))
    valid = jax.lax.broadcasted_iota(jnp.int32, numr.shape, 1) < k_valid
    numr = jnp.where(valid, numr, 0.0)
    prob_ref[...] = numr / jnp.sum(numr, axis=1, keepdims=True)


def head_and_cluster_prob(emb, w1_bf16, b1, w2_bf16, b2, centers_bf16,
                          centers_sq, *, k_valid, alpha=1.0, batch_tile=None):
    assert alpha > 0.0
    B, H = emb.shape
    Kp = centers_bf16.shape[0]
    vmem_limit, vmem_budget = _vmem_config()
    if batch_tile is None:
        per_tb = (2 * H * 4                    # emb input, double-buffered
                  + 2 * H * 4 + 2 * Kp * 4     # head + probs outputs, dbl-buffered
                  + 4 * H * 4 + 2 * Kp * 4)    # f32 temps
        const = 2 * (2 * H * H * 2 + 2 * H * 4 + Kp * H * 2 + Kp * 4)
        batch_tile = _pick_batch_tile(B, per_tb, const, vmem_budget)
    grid = (pl.cdiv(B, batch_tile),)
    kernel = functools.partial(
        head_cluster_kernel,
        inv_alpha=1.0 / float(alpha),
        power=float(alpha + 1) / 2.0,
        k_valid=int(k_valid))
    head_out, probs = pl.pallas_call(
        kernel,
        out_shape=(
            jax.ShapeDtypeStruct((B, H), jnp.float32),
            jax.ShapeDtypeStruct((B, Kp), jnp.float32),
        ),
        grid=grid,
        in_specs=[
            pl.BlockSpec((batch_tile, H), lambda i: (i, 0)),
            pl.BlockSpec((H, H), lambda i: (0, 0)),
            pl.BlockSpec((1, H), lambda i: (0, 0)),
            pl.BlockSpec((H, H), lambda i: (0, 0)),
            pl.BlockSpec((1, H), lambda i: (0, 0)),
            pl.BlockSpec((Kp, H), lambda i: (0, 0)),
            pl.BlockSpec((1, Kp), lambda i: (0, 0)),
        ],
        out_specs=(
            pl.BlockSpec((batch_tile, H), lambda i: (i, 0)),
            pl.BlockSpec((batch_tile, Kp), lambda i: (i, 0)),
        ),
        compiler_params=pltpu.CompilerParams(
            dimension_semantics=("parallel",),
            vmem_limit_bytes=vmem_limit,
        ),
    )(emb, w1_bf16, b1, w2_bf16, b2, centers_bf16, centers_sq)
    return head_out, probs[:, :k_valid]


# ----------------------------------------------------------------------------
# Pure-JAX references (PyTorch semantics, f32 math) for correctness checks
# ----------------------------------------------------------------------------
def ref_masked_mean(h, m):
    m3 = m.astype(jnp.float32)[..., None]
    return jnp.sum(h.astype(jnp.float32) * m3, axis=1) / jnp.sum(m3, axis=1)


def ref_head(x, w1, b1, w2, b2):
    h = jnp.maximum(x @ w1 + b1, 0.0)
    return h @ w2 + b2


def ref_cluster_prob(e, c, alpha=1.0):
    ns = jnp.sum((e[:, None, :] - c[None, :, :]) ** 2, axis=2)
    num = 1.0 / (1.0 + ns / alpha)
    num = num ** (float(alpha + 1) / 2.0)
    return num / jnp.sum(num, axis=1, keepdims=True)


# ----------------------------------------------------------------------------
# SCCLBert (Pallas) wrapper
# ----------------------------------------------------------------------------
class SCCLBertPallas:
    def __init__(self, emb_size, n_clusters, key, alpha=1.0, use_head=True):
        assert alpha > 0.0
        self.emb_size = emb_size
        self.alpha = float(alpha)
        self.use_head = use_head
        self.n_clusters = n_clusters
        self.kp = _round_up(max(n_clusters, 1), 128)   # lane-dense cluster axis

        k1, k2, k3, k4, k5 = jax.random.split(key, 5)
        scale = 1.0 / np.sqrt(emb_size)
        # f32 "training truth" parameters + pre-cast bf16 copies for the kernels.
        self.w1 = jax.random.normal(k1, (emb_size, emb_size), jnp.float32) * scale
        self.b1 = jax.random.normal(k4, (1, emb_size), jnp.float32) * 0.01
        self.w2 = jax.random.normal(k2, (emb_size, emb_size), jnp.float32) * scale
        self.b2 = jax.random.normal(k5, (1, emb_size), jnp.float32) * 0.01
        self.w1_bf16 = self.w1.astype(jnp.bfloat16)
        self.w2_bf16 = self.w2.astype(jnp.bfloat16)

        self.cluster_centers = jax.random.normal(
            k3, (n_clusters, emb_size), jnp.float32)
        centers_padded = jnp.zeros((self.kp, emb_size), jnp.float32)
        centers_padded = centers_padded.at[:n_clusters].set(self.cluster_centers)
        self.centers_bf16 = centers_padded.astype(jnp.bfloat16)
        # ||c||^2 precomputed once (f32, exact); padded rows are zero.
        self.centers_sq = jnp.sum(centers_padded * centers_padded,
                                  axis=1)[None, :]        # (1, Kp) f32

    # --- fused forward path (pool -> head -> cluster prob) ------------------
    def forward_fused(self, hidden_states, attention_mask):
        return scclbert_fused(
            hidden_states, attention_mask,
            self.w1_bf16, self.b1, self.w2_bf16, self.b2,
            self.centers_bf16, self.centers_sq,
            k_valid=self.n_clusters, alpha=self.alpha)

    # --- individual pieces (PyTorch method parity) ---------------------------
    def get_embeddings(self, hidden_states, attention_mask):
        return masked_mean_pool(hidden_states, attention_mask)

    def head_and_cluster_prob(self, embeddings):
        return head_and_cluster_prob(
            embeddings, self.w1_bf16, self.b1, self.w2_bf16, self.b2,
            self.centers_bf16, self.centers_sq,
            k_valid=self.n_clusters, alpha=self.alpha)

    def head(self, embeddings):
        return self.head_and_cluster_prob(embeddings)[0]

    def get_cluster_prob(self, embeddings):
        return self.head_and_cluster_prob(embeddings)[1]

    # TODO(synk): local_consistency needs an external `criterion` (loss fn);
    #             it composes get_cluster_prob outputs and is left to JAX.


if __name__ == "__main__":
    B, S, H, K = 2, 8, 32, 4
    key = jax.random.PRNGKey(0)
    k_h, k_m, k_p = jax.random.split(key, 3)

    # "BERT output" token hidden states (bf16 on the HBM side; the fused kernel
    # is HBM-bound on this tensor) and a padded attention mask.
    hidden_states = jax.random.normal(k_h, (B, S, H), jnp.float32).astype(jnp.bfloat16)
    attention_mask = jnp.concatenate(
        [jnp.ones((B, S - 2), jnp.float32), jnp.zeros((B, 2), jnp.float32)], axis=1
    )

    model = SCCLBertPallas(emb_size=H, n_clusters=K, key=k_p, alpha=1.0, use_head=True)

    # ---- Pallas fused path --------------------------------------------------
    emb, emb_head, probs = model.forward_fused(hidden_states, attention_mask)
    jax.block_until_ready((emb, emb_head, probs))

    # ---- Standalone kernels (API parity paths) ------------------------------
    emb_solo = model.get_embeddings(hidden_states, attention_mask)
    head_solo, probs_solo = model.head_and_cluster_prob(emb_solo)
    jax.block_until_ready((emb_solo, head_solo, probs_solo))

    # ---- Reference path (PyTorch semantics, f32) ----------------------------
    emb_ref = ref_masked_mean(hidden_states, attention_mask)
    emb_head_ref = ref_head(emb_ref, model.w1, model.b1, model.w2, model.b2)
    probs_ref = ref_cluster_prob(emb_ref, model.cluster_centers, alpha=1.0)

    # Pooling accumulates in f32 from the same bf16 input -> tight tolerance.
    np.testing.assert_allclose(np.asarray(emb), np.asarray(emb_ref),
                               rtol=1e-5, atol=1e-5)
    np.testing.assert_allclose(np.asarray(emb_solo), np.asarray(emb_ref),
                               rtol=1e-5, atol=1e-5)
    # Head / cluster prob use bf16 MXU operands -> compare loosely vs f32 ref.
    np.testing.assert_allclose(np.asarray(emb_head), np.asarray(emb_head_ref),
                               rtol=2e-2, atol=2e-2)
    np.testing.assert_allclose(np.asarray(probs), np.asarray(probs_ref),
                               rtol=2e-2, atol=2e-2)
    np.testing.assert_allclose(np.asarray(head_solo), np.asarray(emb_head_ref),
                               rtol=2e-2, atol=2e-2)
    np.testing.assert_allclose(np.asarray(probs_solo), np.asarray(probs_ref),
                               rtol=2e-2, atol=2e-2)
    assert probs.shape == (B, K)
    # Exact row normalization (review correctness note) -> sums are ~exactly 1.
    assert np.allclose(np.asarray(probs).sum(axis=1), 1.0, atol=1e-5)

    print("KERNEL_OK")
</pallas_src>

<mosaic_0001>
module attributes {stable_mosaic.version = 11 : i64} {
  func.func @scclbert_fused_kernel(%arg0: i32, %arg1: memref<2x8x32xbf16, #tpu.memory_space<vmem>>, %arg2: memref<2x8xf32, #tpu.memory_space<vmem>>, %arg3: memref<32x32xbf16, #tpu.memory_space<vmem>>, %arg4: memref<1x32xf32, #tpu.memory_space<vmem>>, %arg5: memref<32x32xbf16, #tpu.memory_space<vmem>>, %arg6: memref<1x32xf32, #tpu.memory_space<vmem>>, %arg7: memref<128x32xbf16, #tpu.memory_space<vmem>>, %arg8: memref<1x128xf32, #tpu.memory_space<vmem>>, %arg9: memref<2x32xf32, #tpu.memory_space<vmem>>, %arg10: memref<2x32xf32, #tpu.memory_space<vmem>>, %arg11: memref<2x128xf32, #tpu.memory_space<vmem>>) attributes {dimension_semantics = [#tpu.dimension_semantics<parallel>], iteration_bounds = array<i64: 1>, scalar_prefetch = 0 : i64, scratch_operands = 0 : i64, tpu.core_type = #tpu.core_type<tc>, window_params = [{transform_indices = @transform_0, window_bounds = array<i64: 2, 8, 32>}, {transform_indices = @transform_1, window_bounds = array<i64: 2, 8>}, {pipeline_mode = #tpu.pipeline_mode<synchronous>, transform_indices = @transform_2, window_bounds = array<i64: 32, 32>}, {pipeline_mode = #tpu.pipeline_mode<synchronous>, transform_indices = @transform_3, window_bounds = array<i64: 1, 32>}, {pipeline_mode = #tpu.pipeline_mode<synchronous>, transform_indices = @transform_4, window_bounds = array<i64: 32, 32>}, {pipeline_mode = #tpu.pipeline_mode<synchronous>, transform_indices = @transform_5, window_bounds = array<i64: 1, 32>}, {pipeline_mode = #tpu.pipeline_mode<synchronous>, transform_indices = @transform_6, window_bounds = array<i64: 128, 32>}, {pipeline_mode = #tpu.pipeline_mode<synchronous>, transform_indices = @transform_7, window_bounds = array<i64: 1, 128>}, {transform_indices = @transform_8, window_bounds = array<i64: 2, 32>}, {transform_indices = @transform_9, window_bounds = array<i64: 2, 32>}, {transform_indices = @transform_10, window_bounds = array<i64: 2, 128>}]} {
    %c0 = arith.constant 0 : index
    %c0_0 = arith.constant 0 : index
    %c0_1 = arith.constant 0 : index
    %0 = vector.load %arg1[%c0, %c0_0, %c0_1] : memref<2x8x32xbf16, #tpu.memory_space<vmem>>, vector<2x8x32xbf16>
    %c0_2 = arith.constant 0 : index
    %c0_3 = arith.constant 0 : index
    %1 = vector.load %arg2[%c0_2, %c0_3] : memref<2x8xf32, #tpu.memory_space<vmem>>, vector<2x8xf32>
    %2 = arith.truncf %1 : vector<2x8xf32> to vector<2x8xbf16>
    %3 = vector.shape_cast %2 : vector<2x8xbf16> to vector<2x8x1xbf16>
    %4 = vector.broadcast %3 : vector<2x8x1xbf16> to vector<2x8x32xbf16>
    %5 = arith.mulf %0, %4 : vector<2x8x32xbf16>
    %6 = arith.extf %5 : vector<2x8x32xbf16> to vector<2x8x32xf32>
    %cst = arith.constant dense<0.000000e+00> : vector<2x32xf32>
    %7 = vector.multi_reduction <add>, %6, %cst [1] : vector<2x8x32xf32> to vector<2x32xf32>
    %cst_4 = arith.constant dense<0.000000e+00> : vector<2xf32>
    %8 = vector.multi_reduction <add>, %1, %cst_4 [1] : vector<2x8xf32> to vector<2xf32>
    %9 = vector.shape_cast %8 : vector<2xf32> to vector<2x1xf32>
    %cst_5 = arith.constant 9.99999971E-10 : f32
    %10 = vector.broadcast %cst_5 : f32 to vector<2x1xf32>
    %11 = arith.maximumf %9, %10 : vector<2x1xf32>
    %12 = vector.broadcast %11 : vector<2x1xf32> to vector<2x32xf32>
    %13 = arith.divf %7, %12 : vector<2x32xf32>
    %c0_6 = arith.constant 0 : index
    %c0_7 = arith.constant 0 : index
    %14 = vector.load %arg9[%c0_6, %c0_7] : memref<2x32xf32, #tpu.memory_space<vmem>>, vector<2x32xf32>
    tpu.vector_store %arg9[%c0_6, %c0_7], %13 {strides = array<i32>} : memref<2x32xf32, #tpu.memory_space<vmem>>, vector<2x32xf32>,
    %15 = arith.truncf %13 : vector<2x32xf32> to vector<2x32xbf16>
    %c0_8 = arith.constant 0 : index
    %c0_9 = arith.constant 0 : index
    %16 = vector.load %arg3[%c0_8, %c0_9] : memref<32x32xbf16, #tpu.memory_space<vmem>>, vector<32x32xbf16>
    %cst_10 = arith.constant dense<0.000000e+00> : vector<2x32xf32>
    %17 = tpu.matmul %15, %16, %cst_10 {dimension_numbers = #tpu.dot_dimension_numbers<[1], [0], [0], [1], [0, 0, 1, 1], [], []>} : vector<2x32xbf16>, vector<32x32xbf16>, vector<2x32xf32> -> vector<2x32xf32>
    %c0_11 = arith.constant 0 : index
    %c0_12 = arith.constant 0 : index
    %18 = vector.load %arg4[%c0_11, %c0_12] : memref<1x32xf32, #tpu.memory_space<vmem>>, vector<1x32xf32>
    %19 = vector.broadcast %18 : vector<1x32xf32> to vector<2x32xf32>
    %20 = arith.addf %17, %19 : vector<2x32xf32>
    %cst_13 = arith.constant 0.000000e+00 : f32
    %21 = vector.broadcast %cst_13 : f32 to vector<2x32xf32>
    %22 = arith.maximumf %20, %21 : vector<2x32xf32>
    %23 = arith.truncf %22 : vector<2x32xf32> to vector<2x32xbf16>
    %c0_14 = arith.constant 0 : index
    %c0_15 = arith.constant 0 : index
    %24 = vector.load %arg5[%c0_14, %c0_15] : memref<32x32xbf16, #tpu.memory_space<vmem>>, vector<32x32xbf16>
    %cst_16 = arith.constant dense<0.000000e+00> : vector<2x32xf32>
    %25 = tpu.matmul %23, %24, %cst_16 {dimension_numbers = #tpu.dot_dimension_numbers<[1], [0], [0], [1], [0, 0, 1, 1], [], []>} : vector<2x32xbf16>, vector<32x32xbf16>, vector<2x32xf32> -> vector<2x32xf32>
    %c0_17 = arith.constant 0 : index
    %c0_18 = arith.constant 0 : index
    %26 = vector.load %arg6[%c0_17, %c0_18] : memref<1x32xf32, #tpu.memory_space<vmem>>, vector<1x32xf32>
    %27 = vector.broadcast %26 : vector<1x32xf32> to vector<2x32xf32>
    %28 = arith.addf %25, %27 : vector<2x32xf32>
    %c0_19 = arith.constant 0 : index
    %c0_20 = arith.constant 0 : index
    %29 = vector.load %arg10[%c0_19, %c0_20] : memref<2x32xf32, #tpu.memory_space<vmem>>, vector<2x32xf32>
    tpu.vector_store %arg10[%c0_19, %c0_20], %28 {strides = array<i32>} : memref<2x32xf32, #tpu.memory_space<vmem>>, vector<2x32xf32>,
    %30 = arith.mulf %13, %13 : vector<2x32xf32>
    %cst_21 = arith.constant dense<0.000000e+00> : vector<2xf32>
    %31 = vector.multi_reduction <add>, %30, %cst_21 [1] : vector<2x32xf32> to vector<2xf32>
    %32 = vector.shape_cast %31 : vector<2xf32> to vector<2x1xf32>
    %c0_22 = arith.constant 0 : index
    %c0_23 = arith.constant 0 : index
    %33 = vector.load %arg7[%c0_22, %c0_23] : memref<128x32xbf16, #tpu.memory_space<vmem>>, vector<128x32xbf16>
    %cst_24 = arith.constant dense<0.000000e+00> : vector<2x128xf32>
    %34 = tpu.matmul %15, %33, %cst_24 {dimension_numbers = #tpu.dot_dimension_numbers<[1], [1], [0], [0], [0, 0, 1, 0], [], []>} : vector<2x32xbf16>, vector<128x32xbf16>, vector<2x128xf32> -> vector<2x128xf32>
    %c0_25 = arith.constant 0 : index
    %c0_26 = arith.constant 0 : index
    %35 = vector.load %arg8[%c0_25, %c0_26] : memref<1x128xf32, #tpu.memory_space<vmem>>, vector<1x128xf32>
    %36 = vector.broadcast %32 : vector<2x1xf32> to vector<2x128xf32>
    %37 = vector.broadcast %35 : vector<1x128xf32> to vector<2x128xf32>
    %38 = arith.addf %36, %37 : vector<2x128xf32>
    %cst_27 = arith.constant 2.000000e+00 : f32
    %39 = vector.broadcast %cst_27 : f32 to vector<2x128xf32>
    %40 = arith.mulf %39, %34 : vector<2x128xf32>
    %41 = arith.subf %38, %40 : vector<2x128xf32>
    %cst_28 = arith.constant 0.000000e+00 : f32
    %42 = vector.broadcast %cst_28 : f32 to vector<2x128xf32>
    %43 = arith.maximumf %41, %42 : vector<2x128xf32>
    %cst_29 = arith.constant 1.000000e+00 : f32
    %44 = vector.broadcast %cst_29 : f32 to vector<2x128xf32>
    %45 = arith.mulf %43, %44 : vector<2x128xf32>
    %cst_30 = arith.constant 1.000000e+00 : f32
    %46 = vector.broadcast %cst_30 : f32 to vector<2x128xf32>
    %47 = arith.addf %46, %45 : vector<2x128xf32>
    %cst_31 = arith.constant 1.000000e+00 : f32
    %48 = vector.broadcast %cst_31 : f32 to vector<2x128xf32>
    %49 = arith.divf %48, %47 : vector<2x128xf32>
    %50 = tpu.iota {dimensions = array<i32: 1>} : vector<2x128xi32>
    %c4_i32 = arith.constant 4 : i32
    %51 = vector.broadcast %c4_i32 : i32 to vector<2x128xi32>
    %52 = arith.cmpi slt, %50, %51 : vector<2x128xi32>
    %cst_32 = arith.constant 0.000000e+00 : f32
    %53 = vector.broadcast %cst_32 : f32 to vector<2x128xf32>
    %54 = arith.select %52, %49, %53 : vector<2x128xi1>, vector<2x128xf32>
    %cst_33 = arith.constant dense<0.000000e+00> : vector<2xf32>
    %55 = vector.multi_reduction <add>, %54, %cst_33 [1] : vector<2x128xf32> to vector<2xf32>
    %56 = vector.shape_cast %55 : vector<2xf32> to vector<2x1xf32>
    %57 = vector.broadcast %56 : vector<2x1xf32> to vector<2x128xf32>
    %58 = arith.divf %54, %57 : vector<2x128xf32>
    %c0_34 = arith.constant 0 : index
    %c0_35 = arith.constant 0 : index
    %59 = vector.load %arg11[%c0_34, %c0_35] : memref<2x128xf32, #tpu.memory_space<vmem>>, vector<2x128xf32>
    tpu.vector_store %arg11[%c0_34, %c0_35], %58 {strides = array<i32>} : memref<2x128xf32, #tpu.memory_space<vmem>>, vector<2x128xf32>,
    return
  }
  func.func @transform_0(%arg0: i32) -> (i32, i32, i32) {
    %c0_i32 = arith.constant 0 : i32
    %c0_i32_0 = arith.constant 0 : i32
    %c0_i32_1 = arith.constant 0 : i32
    return %arg0, %c0_i32, %c0_i32_0 : i32, i32, i32
  }
  func.func @transform_1(%arg0: i32) -> (i32, i32) {
    %c0_i32 = arith.constant 0 : i32
    %c0_i32_0 = arith.constant 0 : i32
    return %arg0, %c0_i32 : i32, i32
  }
  func.func @transform_2(%arg0: i32) -> (i32, i32) {
    %c0_i32 = arith.constant 0 : i32
    %c0_i32_0 = arith.constant 0 : i32
    %c0_i32_1 = arith.constant 0 : i32
    return %c0_i32, %c0_i32_0 : i32, i32
  }
  func.func @transform_3(%arg0: i32) -> (i32, i32) {
    %c0_i32 = arith.constant 0 : i32
    %c0_i32_0 = arith.constant 0 : i32
    %c0_i32_1 = arith.constant 0 : i32
    return %c0_i32, %c0_i32_0 : i32, i32
  }
  func.func @transform_4(%arg0: i32) -> (i32, i32) {
    %c0_i32 = arith.constant 0 : i32
    %c0_i32_0 = arith.constant 0 : i32
    %c0_i32_1 = arith.constant 0 : i32
    return %c0_i32, %c0_i32_0 : i32, i32
  }
  func.func @transform_5(%arg0: i32) -> (i32, i32) {
    %c0_i32 = arith.constant 0 : i32
    %c0_i32_0 = arith.constant 0 : i32
    %c0_i32_1 = arith.constant 0 : i32
    return %c0_i32, %c0_i32_0 : i32, i32
  }
  func.func @transform_6(%arg0: i32) -> (i32, i32) {
    %c0_i32 = arith.constant 0 : i32
    %c0_i32_0 = arith.constant 0 : i32
    %c0_i32_1 = arith.constant 0 : i32
    return %c0_i32, %c0_i32_0 : i32, i32
  }
  func.func @transform_7(%arg0: i32) -> (i32, i32) {
    %c0_i32 = arith.constant 0 : i32
    %c0_i32_0 = arith.constant 0 : i32
    %c0_i32_1 = arith.constant 0 : i32
    return %c0_i32, %c0_i32_0 : i32, i32
  }
  func.func @transform_8(%arg0: i32) -> (i32, i32) {
    %c0_i32 = arith.constant 0 : i32
    %c0_i32_0 = arith.constant 0 : i32
    return %arg0, %c0_i32 : i32, i32
  }
  func.func @transform_9(%arg0: i32) -> (i32, i32) {
    %c0_i32 = arith.constant 0 : i32
    %c0_i32_0 = arith.constant 0 : i32
    return %arg0, %c0_i32 : i32, i32
  }
  func.func @transform_10(%arg0: i32) -> (i32, i32) {
    %c0_i32 = arith.constant 0 : i32
    %c0_i32_0 = arith.constant 0 : i32
    return %arg0, %c0_i32 : i32, i32
  }
}

</mosaic_0001>

<bundles_post_ra>
// kernel: tpu_custom_call.1
= control target key start
LH: loop header
LB: loop body
LE: loop exit
PB: predicated region body
PF: predicated region fallthrough
CT: control target
= control target key end

     0   :  { %16 = vsyncpa [#allocation3], 0  ;;  %vm78_vm0 = vcmask 58368   ;;  %v42_v1 = vlaneseq  ;;  %vm63_vm1 = vcmask 261120   ;;  %v597_v5 = vmov 0.0   ;;  %s759_s0 = inlined_call_operand.vmem [shape: bf16[2,8,32], index: 0, kind: input, shape index: {}]   ;;  %s760_s1 = inlined_call_operand.vmem [shape: f32[2,8], index: 1, kind: input, shape index: {}]   ;;  %s761_s2 = inlined_call_operand.vmem [shape: bf16[32,32], index: 2, kind: input, shape index: {}]   ;;  %s762_s3 = inlined_call_operand.vmem [shape: f32[1,32], index: 3, kind: input, shape index: {}]   ;;  %s763_s4 = inlined_call_operand.vmem [shape: bf16[32,32], index: 4, kind: input, shape index: {}]   ;;  %s764_s5 = inlined_call_operand.vmem [shape: f32[1,32], index: 5, kind: input, shape index: {}]   ;;  %s765_s6 = inlined_call_operand.vmem [shape: bf16[128,32], index: 6, kind: input, shape index: {}]   ;;  %s766_s7 = inlined_call_operand.vmem [shape: f32[1,128], index: 7, kind: input, shape index: {}]   ;;  %s767_s8 = inlined_call_operand.hbm [shape: f32[2,32], index: 8, kind: output, shape index: {0}]   ;;  %s768_s9 = inlined_call_operand.hbm [shape: f32[2,32], index: 9, kind: output, shape index: {1}]   ;;  %s769_s10 = inlined_call_operand.hbm [shape: f32[2,128], index: 10, kind: output, shape index: {2}]  }
   0x1   :  { %v37_v0 = vld [vmem:[%s760_s1] sm:$0x3]  ;;  %v513_v2 = vld [vmem:[%s765_s6 + $0x38] sm:$0xff]   ;;  %488 = vmatprep.subr.bf16.mxu0 %v597_v5  ;;  %472 = vmatprep.subr.bf16.mxu1 %v597_v5  ;;  %v514_v10 = vld [vmem:[%s765_s6 + $0x30] sm:$0xff]  }
   0x2   :  { %v79_v3 = vsel %vm78_vm0, %v37_v0, 0.0  ;;  %v38_v4 = vpack.c.bf16 %v37_v0, %v37_v0  ;;  %v43_v6 = vshrl.u32 %v42_v1, 7  ;;  %v331_v7 = vsel %vm63_vm1, %v513_v2, 0  ;;  %v515_v14 = vld [vmem:[%s765_s6 + $0x28] sm:$0xff]  }
   0x3   :  { %80 = vadd.xlane.f32.xlu0 %v79_v3  ;;  %489 = vmatpush3.bf16.xpose.msra.mxu0 %v331_v7  ;;  %v328_v12 = vsel %vm63_vm1, %v514_v10, 0 }
   0x4   :  { %v40_v8 = vpack.i.b16 %v38_v4, %v38_v4  ;;  %v44_v9 = vsub.s32 0, %v43_v6  ;;  %490 = vmatprep.subr.bf16.mxu0 %v597_v5  ;;  %v49_v13 = vshrl.u32 %v38_v4, 16 }
   0x6   :  { %v45_v11 = vrot.slane %v40_v8, %v44_v9 }
   0x8   :  { %47 = vbcast.lane.c.b16.xlu1 %v45_v11, 256 }
   0xb   :  { %491 = vmatpush3.bf16.xpose.msra.mxu0 %v328_v12 }
   0xc   :  { %492 = vmatprep.subr.bf16.mxu0 %v597_v5 }
   0xd   :  { %17 = vsyncpa [#allocation5], 0  ;;  %v50_v15 = vpack.i.b16 %v49_v13, %v49_v13  ;;  %v325_v16 = vsel %vm63_vm1, %v515_v14, 0  ;;  %v516_v18 = vld [vmem:[%s765_s6 + $0x20] sm:$0xff]   ;;  %v517_v20 = vld [vmem:[%s765_s6 + $0x18] sm:$0xff]   ;;  %vm598_vm2 = vmmov 0  }
   0xe   :  { %v322_v19 = vsel %vm63_vm1, %v516_v18, 0  ;;  %v319_v21 = vsel %vm63_vm1, %v517_v20, 0  ;;  %v520_v22 = vld [vmem:[%s761_s2 + $0x8] sm:$0xff]   ;;  %v522_v23 = vld [vmem:[%s761_s2] sm:$0xff]   ;;  %v518_v24 = vld [vmem:[%s765_s6 + $0x10] sm:$0xff]   ;;  %476 = vmatprep.mubr.msk.bf16.mxu1 %vm598_vm2, %v597_v5  ;;  %504 = vmatprep.mubr.msk.bf16.mxu0 %vm598_vm2, %v597_v5  ;;  %vm94_vm3 = vcmask 1041409  }
   0xf   :  { %v55_v17 = vrot.slane %v50_v15, %v44_v9  ;;  %473 = vmatpush3.bf16.msra.mxu1 %v520_v22  ;;  %v316_v25 = vsel %vm63_vm1, %v518_v24, 0  ;;  %v519_v26 = vld [vmem:[%s765_s6 + $0x8] sm:$0xff]   ;;  %v521_v28 = vld [vmem:[%s765_s6] sm:$0xff]   ;;  %vm97_vm4 = vcmask 254976   ;;  %vm391_vm6 = vcmask 1041408  }
  0x10   :  { %474 = vmatprep.subr.bf16.mxu1 %v597_v5  ;;  %v313_v27 = vsel %vm63_vm1, %v519_v26, 0  ;;  %v310_v29 = vsel %vm63_vm1, %v521_v28, 0  ;;  %v35_v30 = vld [vmem:[%s759_s0] sm:$0xf]  ;;  %v36_v39 = vld [vmem:[%s759_s0 + $0x4] sm:$0xf] }
  0x11   :  { %v523_v11 = vld [vmem:[%s763_s4 + $0x8] sm:$0xff]   ;;  %v524_v12 = vld [vmem:[%s763_s4] sm:$0xff]  }
  0x12   :  { %v456_v13 = vld [vmem:[%s766_s7] ss:$0 sm:$0xff] }
  0x13   :  { %493 = vmatpush3.bf16.xpose.msra.mxu0 %v325_v16  ;;  %475 = vmatpush3.bf16.msra.mxu1 %v522_v23  ;;  %v439_v15 = vld [vmem:[%s762_s3] ss:$0 sm:$0xff]  ;;  %s599_s3 = smov [#allocation2]  }
  0x14   :  { %494 = vmatprep.subr.bf16.mxu0 %v597_v5  ;;  %480 = vmatprep.subr.bf16.mxu1 %v597_v5  ;;  %s404_s4 = sshll.u32 %s599_s3, 4  ;;  %s405_s4 = int_to_ptr.vmem [resolvable:$true] %s404_s4 }
  0x15   :  { %s533_s7 = scalar_lea.vmem %s405_s4, 32  ;;  %p538_p1 = scmp.lt.s32.totalorder %s405_s4, %s405_s4 }
  0x16   :  { %p534_p0 = scmp.ne.s32.totalorder %s405_s4, %s533_s7  ;;  %p539_p2 = scmp.lt.s32.totalorder %s533_s7, %s533_s7 }
  0x18   :  { %p540_p3 = por %p539_p2, %p538_p1 }
  0x19   :  { %57 = vbcast.lane.c.b16.xlu0 %v55_v17, 256 }
  0x1a   :  { %p541_p4 = pnand %p540_p3, %p534_p0 }
  0x1b   :  { %495 = vmatpush3.bf16.xpose.msra.mxu0 %v322_v19 }
  0x1c   :  { %496 = vmatprep.subr.bf16.mxu0 %v597_v5 }
  0x23   :  { %497 = vmatpush3.bf16.xpose.msra.mxu0 %v319_v21 }
  0x24   :  { %498 = vmatprep.subr.bf16.mxu0 %v597_v5 }
  0x2b   :  { %499 = vmatpush3.bf16.xpose.msra.mxu0 %v316_v25 }
  0x2c   :  { %500 = vmatprep.subr.bf16.mxu0 %v597_v5 }
  0x33   :  { %501 = vmatpush3.bf16.xpose.msra.mxu0 %v313_v27 }
  0x34   :  { %502 = vmatprep.subr.bf16.mxu0 %v597_v5 }
  0x3b   :  { %503 = vmatpush3.bf16.xpose.msra.mxu0 %v310_v29 }
  0x7a   :  { %v48_v31 = vpop.permute.xlu1 %47 }
  0x7b   :  { %v59_v32 = vmul.bf16 %v48_v31, %v35_v30  ;;  %v388_v31 = vand.u32 127, %v42_v1 }
  0x7d   :  { %v61_v33 = vunpack.c.l.bf16 %v59_v32  ;;  %vm389_vm5 = vcmp.lt.s32.totalorder %v388_v31, 4 }
  0x7f   :  { %v64_v34 = vsel %vm63_vm1, %v61_v33, 0.0 }
  0x80   :  { %v65_v35 = vrot.slane %v64_v34, 4 }
  0x82   :  { %v66_v36 = vadd.f32 %v65_v35, %v64_v34 }
  0x84   :  { %v67_v40 = vrot.slane %v66_v36, 2 }
  0x86   :  { %v68_v45 = vadd.f32 %v67_v40, %v66_v36 }
  0x88   :  { %v69_v48 = vrot.slane %v68_v45, 1 }
  0x8a   :  { %v70_v51 = vadd.f32 %v69_v48, %v68_v45 }
  0x8c   :  { %v81_v37 = vpop.xlane.xlu0 %80 }
  0x8d   :  { %v82_v38 = vmax.f32 %v81_v37, 1e-09 }
  0x8f   :  { %v84_v41 = vrot.slane %v82_v38, 1  ;;  %525 = vrcp.f32 %v82_v38 }
  0x90   :  { %v58_v42 = vpop.permute.xlu0 %57 }
  0x91   :  { %v60_v43 = vmul.bf16 %v58_v42, %v36_v39  ;;  %527 = vrcp.f32 %v84_v41 }
  0x93   :  { %v62_v44 = vunpack.c.l.bf16 %v60_v43 }
  0x95   :  { %v71_v46 = vsel %vm63_vm1, %v62_v44, 0.0 }
  0x96   :  { %v72_v47 = vrot.slane %v71_v46, 4 }
  0x98   :  { %v73_v49 = vadd.f32 %v72_v47, %v71_v46 }
  0x9a   :  { %v74_v50 = vrot.slane %v73_v49, 2 }
  0x9c   :  { %v75_v52 = vadd.f32 %v74_v50, %v73_v49  ;;  %v526_v53 = vpop.eup %525 }
  0x9d   :  { %v88_v56 = vmul.f32 %v526_v53, %v70_v51 }
  0x9e   :  { %v76_v54 = vrot.slane %v75_v52, 1  ;;  %v528_v57 = vpop.eup %527 }
  0x9f   :  { %v99_v61 = vpack.c.bf16 %v88_v56, %v88_v56  ;;  %v243_v0 = vmul.f32 %v88_v56, %v88_v56 }
  0xa0   :  { %v77_v55 = vadd.f32 %v76_v54, %v75_v52 }
  0xa1   :  { %v114_v7 = vunpack.c.l.b16 %v99_v61 }
  0xa2   :  { %v90_v58 = vmul.f32 %v528_v57, %v77_v55 }
  0xa4   :  { %v100_v59 = vpack.c.bf16 %v90_v58, %v90_v58  ;;  %v244_v60 = vmul.f32 %v90_v58, %v90_v58  ;;  %v93_v62 = vrot.slane %v90_v58, 7 }
  0xa6   :  { %v115_v63 = vunpack.c.l.b16 %v100_v59  ;;  %v247_v2 = vrot.slane %v244_v60, 7  ;;  %v95_v3 = vsel %vm94_vm3, %v93_v62, %v88_v56 }
  0xa7   :  { %98 = vst.msk [vmem:[#allocation2] sm:$0x3] %vm97_vm4, %v95_v3 }
  0xa8   :  { %v116_v4 = vrot.slane %v115_v63, 7  ;;  %v248_v6 = vsel %vm94_vm3, %v247_v2, %v243_v0 }
  0xa9   :  { %v250_v8 = vsel %vm97_vm4, %v248_v6, 0.0 }
  0xaa   :  { %251 = vadd.xlane.f32.xlu1 %v250_v8  ;;  %v117_v9 = vsel %vm94_vm3, %v116_v4, %v114_v7 }
  0xab   :  { %v118_v10 = vpack.c.b16 %v117_v9, %v117_v9 }
  0xad   :  { %477 = vmatmul.mubr.msk.bf16.vlgmr.msra.gmra.mxu1 %vm63_vm1, %v118_v10  ;;  %505 = vmatmul.mubr.msk.bf16.vlgmr.msra.gmra.mxu0 %vm63_vm1, %v118_v10 }
  0xae   :  { %484 = vmatprep.mubr.msk.bf16.mxu1 %vm598_vm2, %v597_v5  ;;  %481 = vmatpush3.bf16.msra.mxu1 %v523_v11 }
  0xaf   :  { %482 = vmatprep.subr.bf16.mxu1 %v597_v5 }
  0xb2   :  { %483 = vmatpush3.bf16.msra.mxu1 %v524_v12 }
 0x133   :  { %v252_v14 = vpop.xlane.xlu1 %251 }
 0x134   :  { %v380_v18 = vadd.f32 %v456_v13, %v252_v14 }
 0x16d   :  { %v168_v16 = vpop.f32.mrf.mxu1  ;;  %v367_v17 = vpop.f32.mrf.mxu0 }
 0x16e   :  { %v169_v19 = vadd.f32 %v439_v15, %v168_v16  ;;  %v381_v20 = vmul.f32 2.0, %v367_v17 }
 0x16f   :  { %v478_v5 = vpop.f32.mrf.mxu1  ;;  %v506_v21 = vpop.f32.mrf.mxu0 }
 0x170   :  { %v174_v22 = vmax.f32 %v169_v19, 0.0  ;;  %v382_v23 = vsub.f32 %v380_v18, %v381_v20 }
 0x171   :  { %v171_v24 = vpop.f32.mrf.mxu1  ;;  %v370_v25 = vpop.f32.mrf.mxu0 }
 0x172   :  { %v175_v26 = vpack.c.bf16 %v174_v22, %v174_v22  ;;  %v383_v27 = vmax.f32 %v382_v23, 0.0 }
 0x173   :  { %v479_v28 = vpop.f32.mrf.mxu1  ;;  %v507_v29 = vpop.f32.mrf.mxu0 }
 0x174   :  { %v384_v30 = vadd.f32 1.0, %v383_v27  ;;  %485 = vmatmul.mubr.msk.bf16.vlgmr.msra.gmra.mxu1 %vm63_vm1, %v175_v26 }
 0x176   :  { %529 = vrcp.f32 %v384_v30 }
 0x183   :  { %v530_v32 = vpop.eup %529 }
 0x184   :  { %v390_v33 = vsel %vm389_vm5, %v530_v32, 0.0 }
 0x185   :  { %v392_v34 = vsel %vm391_vm6, %v390_v33, 0.0 }
 0x186   :  { %393 = vadd.xlane.f32.xlu0 %v392_v34 }
 0x187   :  { %544 = shalt.err (!%p541_p4)
}
 0x188   :  { %407 = dma.vmem_to_hbm [thread:$0]  %s405_s4, 32, %s767_s8, [#allocation3]   ;;  %v443_v37 = vld [vmem:[%s764_s5] ss:$0 sm:$0xff] }
 0x189   :  { %s600_s26 = smov [#allocation4]   ;;  %s601_s28 = smov [#allocation6]  }
 0x18a   :  { %s414_s27 = sshll.u32 %s600_s26, 4  ;;  %s424_s29 = sshll.u32 %s601_s28, 4  ;;  %s415_s27 = int_to_ptr.vmem [resolvable:$true] %s414_s27  ;;  %s425_s29 = int_to_ptr.vmem [resolvable:$true] %s424_s29 }
 0x18b   :  { %s553_s8 = scalar_lea.vmem %s415_s27, 32  ;;  %p558_p6 = scmp.lt.s32.totalorder %s415_s27, %s415_s27 }
 0x18c   :  { %p554_p5 = scmp.ne.s32.totalorder %s415_s27, %s553_s8  ;;  %p559_p7 = scmp.lt.s32.totalorder %s553_s8, %s553_s8 }
 0x18e   :  { %p560_p8 = por %p559_p7, %p558_p6 }
 0x190   :  { %p561_p9 = pnand %p560_p8, %p554_p5 }
 0x20f   :  { %v394_v1 = vpop.xlane.xlu0 %393 }
 0x210   :  { %531 = vrcp.f32 %v394_v1 }
 0x21d   :  { %v532_v35 = vpop.eup %531 }
 0x21e   :  { %v396_v36 = vmul.f32 %v532_v35, %v390_v33 }
 0x220   :  { %397 = vst [vmem:[#allocation6] sm:$0x3] %v396_v36 }
 0x234   :  { %v236_v38 = vpop.f32.mrf.mxu1 }
 0x235   :  { %v237_v39 = vadd.f32 %v443_v37, %v236_v38 }
 0x236   :  { %v486_v40 = vpop.f32.mrf.mxu1 }
 0x237   :  { %242 = vst.msk [vmem:[#allocation4] sm:$0x3] %vm97_vm4, %v237_v39 }
 0x238   :  { %v239_v41 = vpop.f32.mrf.mxu1 }
 0x239   :  { %564 = shalt.err (!%p561_p9)
}
 0x23a   :  { %417 = dma.vmem_to_hbm [thread:$0]  %s415_s27, 32, %s768_s9, [#allocation5]  }
 0x23b   :  { %s573_s30 = scalar_lea.vmem %s425_s29, 32  ;;  %p578_p11 = scmp.lt.s32.totalorder %s425_s29, %s425_s29 }
 0x23c   :  { %p574_p10 = scmp.ne.s32.totalorder %s425_s29, %s573_s30  ;;  %p579_p12 = scmp.lt.s32.totalorder %s573_s30, %s573_s30 }
 0x23e   :  { %p580_p13 = por %p579_p12, %p578_p11 }
 0x240   :  { %p581_p0 = pnand %p580_p13, %p574_p10 }
 0x242   :  { %584 = shalt.err (!%p581_p0)
}
 0x243   :  { %427 = dma.vmem_to_hbm [thread:$0]  %s425_s29, 32, %s769_s10, [#allocation5]   ;;  %v487_v42 = vpop.f32.mrf.mxu1 }
 0x244   :  { %593 = dma.done.wait [#allocation3], 32  }
 0x245   :  { %594 = vsyncadd [#allocation3], 4294967264 }
 0x246   :  { %595 = dma.done.wait [#allocation5], 64  }
 0x247   :  { %596 = vsyncadd [#allocation5], 4294967232 }
 0x248   :  { %437 = vsyncpa [#allocation3], 1 }
 0x249   :  { %438 = vsyncpa [#allocation5], 1 }

</bundles_post_ra>
